<compile_context>
chip_gen: v7x
topology: tpu7x:2x2x1
jax: 0.10.0
libtpu: 0.0.40
codegen_flags: <defaults>
</compile_context>

<pallas_src>
import functools

import numpy as np
import jax
import jax.numpy as jnp
from jax.experimental import pallas as pl
from jax.experimental.pallas import tpu as pltpu

INPUT = 5
HIDDEN = 20
HPAD = 32                 # per-gate hidden padded to 32 lanes
GPAD = 4 * HPAD           # 128 lanes total -> lane-dense gates tile


def _sequence_kernel(x_ref, wih_ref, whh_ref, b_ref,
                     w1_ref, b1_ref, w2_ref, b2_ref,
                     out_ref, *, seq_len, batch_pad):
    # ---- hoisted loads (read each small operand exactly once) ----------------
    x2d = x_ref[...]                  # (T*Bp, INPUT)
    wih = wih_ref[...]                # (INPUT, GPAD)  i/f/o columns pre-scaled by 0.5
    whh = whh_ref[...]                # (HPAD, GPAD)   i/f/o columns pre-scaled by 0.5
    b = b_ref[...]                    # (1, GPAD)      i/f/o lanes   pre-scaled by 0.5

    # ---- input projection for ALL time steps in one MXU matmul ---------------
    ih_all = jnp.dot(x2d, wih, preferred_element_type=jnp.float32) + b   # (T*Bp, GPAD)

    h = jnp.zeros((batch_pad, HPAD), jnp.float32)
    c = jnp.zeros((batch_pad, HPAD), jnp.float32)

    # ---- statically unrolled recurrence (T is small & fixed) ------------------
    for t in range(seq_len):
        # 8-sublane-aligned row slice of the precomputed input projection.
        gates = (ih_all[t * batch_pad:(t + 1) * batch_pad, :]
                 + jnp.dot(h, whh, preferred_element_type=jnp.float32))   # (Bp, GPAD)

        # ONE full-width EUP pass.  Because the i/f/o pre-activations arrive
        # pre-halved, sigmoid(z) == 0.5 * (1 + tanh(z/2)) == 0.5 * (1 + t_*).
        t_all = jnp.tanh(gates)
        t_i = t_all[:, 0 * HPAD:1 * HPAD]
        t_f = t_all[:, 1 * HPAD:2 * HPAD]
        t_g = t_all[:, 2 * HPAD:3 * HPAD]    # g gate: plain tanh (unscaled columns)
        t_o = t_all[:, 3 * HPAD:4 * HPAD]

        # c = f*c + i*g ; h = o*tanh(c), with sigmoid folded as 0.5*(1 + t).
        c = 0.5 * ((1.0 + t_f) * c + (1.0 + t_i) * t_g)
        h = (0.5 * (1.0 + t_o)) * jnp.tanh(c)

    # ---- head: Linear(20->5) then Linear(5->1) on h_n -------------------------
    y1 = jnp.dot(h, w1_ref[...], preferred_element_type=jnp.float32) + b1_ref[...]   # (Bp, 5)
    y2 = jnp.dot(y1, w2_ref[...], preferred_element_type=jnp.float32) + b2_ref[...]  # (Bp, 1)
    out_ref[...] = y2


def pack_params(params):
    """Transpose + zero-pad + gate-prescale the PyTorch-shaped weights.

    Gate k's real columns land at lanes [k*HPAD, k*HPAD + HIDDEN); padded lanes
    and padded hidden rows are zero, which keeps the padded part of h/c exactly
    zero throughout the recurrence.  The sigmoid gates' (i, f, o) columns of
    W_ih, W_hh and the bias are multiplied by 0.5 so the kernel can use the
    identity sigmoid(z) = 0.5*(1 + tanh(z/2)) with a single tanh pass.
    """
    w_ih, w_hh, b_ih, b_hh, w1, b1, w2, b2 = params

    def pad_gate_cols(w_t):                       # (rows, 4*HIDDEN) -> (rows, GPAD)
        rows = w_t.shape[0]
        out = jnp.zeros((rows, GPAD), jnp.float32)
        for k in range(4):
            out = out.at[:, k * HPAD:k * HPAD + HIDDEN].set(
                w_t[:, k * HIDDEN:(k + 1) * HIDDEN])
        return out

    # Per-lane pre-scale: 0.5 on sigmoid gates (i, f, o), 1.0 on the tanh gate (g).
    scale = np.full((GPAD,), 0.5, np.float32)
    scale[2 * HPAD:3 * HPAD] = 1.0
    scale = jnp.asarray(scale)[None, :]

    wih_p = pad_gate_cols(w_ih.T) * scale                                    # (INPUT, 128)
    whh_p = (jnp.zeros((HPAD, GPAD), jnp.float32).at[:HIDDEN].set(
        pad_gate_cols(w_hh.T))) * scale                                      # (32, 128)
    b_p = pad_gate_cols((b_ih + b_hh)[None, :]) * scale                      # (1, 128)
    w1_p = jnp.zeros((HPAD, 5), jnp.float32).at[:HIDDEN].set(w1.T)           # (32, 5)
    b1_p = b1.reshape(1, 5)
    w2_p = w2.T                                                              # (5, 1)
    b2_p = b2.reshape(1, 1)
    return wih_p, whh_p, b_p, w1_p, b1_p, w2_p, b2_p


def sequence_forward(x, params):
    """x: (T, B, INPUT) float32.  Returns (1, B, 1) float32 (== PyTorch h_n path)."""
    T, B, F = x.shape
    assert F == INPUT
    Bp = ((B + 7) // 8) * 8                       # pad batch to 8 sublanes

    kp = pack_params(params)
    # XLA-side layout plumbing: pad batch, flatten time into the sublane dim.
    x_pad = jnp.zeros((T, Bp, INPUT), x.dtype).at[:, :B, :].set(x)
    x2d = x_pad.reshape(T * Bp, INPUT)

    vmem = lambda: pl.BlockSpec(memory_space=pltpu.MemorySpace.VMEM)

    out = pl.pallas_call(
        functools.partial(_sequence_kernel, seq_len=T, batch_pad=Bp),
        out_shape=jax.ShapeDtypeStruct((Bp, 1), jnp.float32),
        in_specs=[vmem() for _ in range(8)],
        out_specs=vmem(),
    )(x2d, *kp)

    return out[:B].reshape(1, B, 1)


def sequence_ref(x, params):
    """Pure-JAX reference (PyTorch LSTM semantics, zero initial state)."""
    w_ih, w_hh, b_ih, b_hh, w1, b1, w2, b2 = params
    T, B, _ = x.shape
    H = HIDDEN
    wih_t, whh_t = w_ih.T, w_hh.T
    b = (b_ih + b_hh)[None, :]

    def step(carry, xt):
        h, c = carry
        gates = xt @ wih_t + h @ whh_t + b
        i = jax.nn.sigmoid(gates[:, 0 * H:1 * H])
        f = jax.nn.sigmoid(gates[:, 1 * H:2 * H])
        g = jnp.tanh(gates[:, 2 * H:3 * H])
        o = jax.nn.sigmoid(gates[:, 3 * H:4 * H])
        c = f * c + i * g
        h = o * jnp.tanh(c)
        return (h, c), None

    (h_n, _), _ = jax.lax.scan(
        step,
        (jnp.zeros((B, H), jnp.float32), jnp.zeros((B, H), jnp.float32)),
        x)
    y = h_n @ w1.T + b1
    y = y @ w2.T + b2
    return y[None]                                 # (1, B, 1)


def init_params(key):
    """Deterministic synthetic parameters matching nn.LSTM(5,20,1) + Linear shapes
    (PyTorch layouts: weight_ih_l0 (4H,in), weight_hh_l0 (4H,H), linear.weight (out,in))."""
    ks = jax.random.split(key, 8)
    u = lambda k, shape, bound: jax.random.uniform(
        k, shape, jnp.float32, minval=-bound, maxval=bound)

    k_lstm = 1.0 / np.sqrt(HIDDEN)
    w_ih = u(ks[0], (4 * HIDDEN, INPUT), k_lstm)
    w_hh = u(ks[1], (4 * HIDDEN, HIDDEN), k_lstm)
    b_ih = u(ks[2], (4 * HIDDEN,), k_lstm)
    b_hh = u(ks[3], (4 * HIDDEN,), k_lstm)

    k1 = 1.0 / np.sqrt(HIDDEN)
    w1 = u(ks[4], (5, HIDDEN), k1)
    b1 = u(ks[5], (5,), k1)
    k2 = 1.0 / np.sqrt(5)
    w2 = u(ks[6], (1, 5), k2)
    b2 = u(ks[7], (1,), k2)

    return w_ih, w_hh, b_ih, b_hh, w1, b1, w2, b2


if __name__ == "__main__":
    key = jax.random.PRNGKey(0)
    k_in, k_par = jax.random.split(key)

    T, B = 8, 4                                    # (seq_len, batch)
    x = jax.random.normal(k_in, (T, B, INPUT), jnp.float32)
    params = init_params(k_par)

    out = sequence_forward(x, params)
    out = jax.block_until_ready(out)

    ref = sequence_ref(x, params)
    np.testing.assert_allclose(np.asarray(out), np.asarray(ref),
                               rtol=1e-5, atol=1e-5)
    assert out.shape == (1, B, 1)
    print("KERNEL_OK")
</pallas_src>

<mosaic_0001>
module attributes {stable_mosaic.version = 11 : i64} {
  func.func @_sequence_kernel(%arg0: memref<64x5xf32, #tpu.memory_space<vmem>>, %arg1: memref<5x128xf32, #tpu.memory_space<vmem>>, %arg2: memref<32x128xf32, #tpu.memory_space<vmem>>, %arg3: memref<1x128xf32, #tpu.memory_space<vmem>>, %arg4: memref<32x5xf32, #tpu.memory_space<vmem>>, %arg5: memref<1x5xf32, #tpu.memory_space<vmem>>, %arg6: memref<5x1xf32, #tpu.memory_space<vmem>>, %arg7: memref<1x1xf32, #tpu.memory_space<vmem>>, %arg8: memref<8x1xf32, #tpu.memory_space<vmem>>) attributes {dimension_semantics = [], scalar_prefetch = 0 : i64, scratch_operands = 0 : i64, tpu.core_type = #tpu.core_type<tc>} {
    %c0 = arith.constant 0 : index
    %c0_0 = arith.constant 0 : index
    %0 = vector.load %arg0[%c0, %c0_0] : memref<64x5xf32, #tpu.memory_space<vmem>>, vector<64x5xf32>
    %c0_1 = arith.constant 0 : index
    %c0_2 = arith.constant 0 : index
    %1 = vector.load %arg1[%c0_1, %c0_2] : memref<5x128xf32, #tpu.memory_space<vmem>>, vector<5x128xf32>
    %c0_3 = arith.constant 0 : index
    %c0_4 = arith.constant 0 : index
    %2 = vector.load %arg2[%c0_3, %c0_4] : memref<32x128xf32, #tpu.memory_space<vmem>>, vector<32x128xf32>
    %c0_5 = arith.constant 0 : index
    %c0_6 = arith.constant 0 : index
    %3 = vector.load %arg3[%c0_5, %c0_6] : memref<1x128xf32, #tpu.memory_space<vmem>>, vector<1x128xf32>
    %cst = arith.constant dense<0.000000e+00> : vector<64x128xf32>
    %4 = tpu.matmul %0, %1, %cst {dimension_numbers = #tpu.dot_dimension_numbers<[1], [0], [0], [1], [0, 0, 1, 1], [], []>} : vector<64x5xf32>, vector<5x128xf32>, vector<64x128xf32> -> vector<64x128xf32>
    %5 = vector.broadcast %3 : vector<1x128xf32> to vector<64x128xf32>
    %6 = arith.addf %4, %5 : vector<64x128xf32>
    %cst_7 = arith.constant 0.000000e+00 : f32
    %7 = vector.broadcast %cst_7 : f32 to vector<8x32xf32>
    %cst_8 = arith.constant 0.000000e+00 : f32
    %8 = vector.broadcast %cst_8 : f32 to vector<8x32xf32>
    %9 = vector.extract_strided_slice %6 {offsets = [0, 0], sizes = [8, 128], strides = [1, 1]} : vector<64x128xf32> to vector<8x128xf32>
    %cst_9 = arith.constant dense<0.000000e+00> : vector<8x128xf32>
    %10 = tpu.matmul %7, %2, %cst_9 {dimension_numbers = #tpu.dot_dimension_numbers<[1], [0], [0], [1], [0, 0, 1, 1], [], []>} : vector<8x32xf32>, vector<32x128xf32>, vector<8x128xf32> -> vector<8x128xf32>
    %11 = arith.addf %9, %10 : vector<8x128xf32>
    %12 = math.tanh %11 : vector<8x128xf32>
    %13 = vector.extract_strided_slice %12 {offsets = [0, 0], sizes = [8, 32], strides = [1, 1]} : vector<8x128xf32> to vector<8x32xf32>
    %14 = vector.extract_strided_slice %12 {offsets = [0, 32], sizes = [8, 32], strides = [1, 1]} : vector<8x128xf32> to vector<8x32xf32>
    %15 = vector.extract_strided_slice %12 {offsets = [0, 64], sizes = [8, 32], strides = [1, 1]} : vector<8x128xf32> to vector<8x32xf32>
    %16 = vector.extract_strided_slice %12 {offsets = [0, 96], sizes = [8, 32], strides = [1, 1]} : vector<8x128xf32> to vector<8x32xf32>
    %cst_10 = arith.constant 1.000000e+00 : f32
    %17 = vector.broadcast %cst_10 : f32 to vector<8x32xf32>
    %18 = arith.addf %17, %14 : vector<8x32xf32>
    %19 = arith.mulf %18, %8 : vector<8x32xf32>
    %cst_11 = arith.constant 1.000000e+00 : f32
    %20 = vector.broadcast %cst_11 : f32 to vector<8x32xf32>
    %21 = arith.addf %20, %13 : vector<8x32xf32>
    %22 = arith.mulf %21, %15 : vector<8x32xf32>
    %23 = arith.addf %19, %22 : vector<8x32xf32>
    %cst_12 = arith.constant 5.000000e-01 : f32
    %24 = vector.broadcast %cst_12 : f32 to vector<8x32xf32>
    %25 = arith.mulf %24, %23 : vector<8x32xf32>
    %cst_13 = arith.constant 1.000000e+00 : f32
    %26 = vector.broadcast %cst_13 : f32 to vector<8x32xf32>
    %27 = arith.addf %26, %16 : vector<8x32xf32>
    %cst_14 = arith.constant 5.000000e-01 : f32
    %28 = vector.broadcast %cst_14 : f32 to vector<8x32xf32>
    %29 = arith.mulf %28, %27 : vector<8x32xf32>
    %30 = math.tanh %25 : vector<8x32xf32>
    %31 = arith.mulf %29, %30 : vector<8x32xf32>
    %32 = vector.extract_strided_slice %6 {offsets = [8, 0], sizes = [8, 128], strides = [1, 1]} : vector<64x128xf32> to vector<8x128xf32>
    %cst_15 = arith.constant dense<0.000000e+00> : vector<8x128xf32>
    %33 = tpu.matmul %31, %2, %cst_15 {dimension_numbers = #tpu.dot_dimension_numbers<[1], [0], [0], [1], [0, 0, 1, 1], [], []>} : vector<8x32xf32>, vector<32x128xf32>, vector<8x128xf32> -> vector<8x128xf32>
    %34 = arith.addf %32, %33 : vector<8x128xf32>
    %35 = math.tanh %34 : vector<8x128xf32>
    %36 = vector.extract_strided_slice %35 {offsets = [0, 0], sizes = [8, 32], strides = [1, 1]} : vector<8x128xf32> to vector<8x32xf32>
    %37 = vector.extract_strided_slice %35 {offsets = [0, 32], sizes = [8, 32], strides = [1, 1]} : vector<8x128xf32> to vector<8x32xf32>
    %38 = vector.extract_strided_slice %35 {offsets = [0, 64], sizes = [8, 32], strides = [1, 1]} : vector<8x128xf32> to vector<8x32xf32>
    %39 = vector.extract_strided_slice %35 {offsets = [0, 96], sizes = [8, 32], strides = [1, 1]} : vector<8x128xf32> to vector<8x32xf32>
    %cst_16 = arith.constant 1.000000e+00 : f32
    %40 = vector.broadcast %cst_16 : f32 to vector<8x32xf32>
    %41 = arith.addf %40, %37 : vector<8x32xf32>
    %42 = arith.mulf %41, %25 : vector<8x32xf32>
    %cst_17 = arith.constant 1.000000e+00 : f32
    %43 = vector.broadcast %cst_17 : f32 to vector<8x32xf32>
    %44 = arith.addf %43, %36 : vector<8x32xf32>
    %45 = arith.mulf %44, %38 : vector<8x32xf32>
    %46 = arith.addf %42, %45 : vector<8x32xf32>
    %cst_18 = arith.constant 5.000000e-01 : f32
    %47 = vector.broadcast %cst_18 : f32 to vector<8x32xf32>
    %48 = arith.mulf %47, %46 : vector<8x32xf32>
    %cst_19 = arith.constant 1.000000e+00 : f32
    %49 = vector.broadcast %cst_19 : f32 to vector<8x32xf32>
    %50 = arith.addf %49, %39 : vector<8x32xf32>
    %cst_20 = arith.constant 5.000000e-01 : f32
    %51 = vector.broadcast %cst_20 : f32 to vector<8x32xf32>
    %52 = arith.mulf %51, %50 : vector<8x32xf32>
    %53 = math.tanh %48 : vector<8x32xf32>
    %54 = arith.mulf %52, %53 : vector<8x32xf32>
    %55 = vector.extract_strided_slice %6 {offsets = [16, 0], sizes = [8, 128], strides = [1, 1]} : vector<64x128xf32> to vector<8x128xf32>
    %cst_21 = arith.constant dense<0.000000e+00> : vector<8x128xf32>
    %56 = tpu.matmul %54, %2, %cst_21 {dimension_numbers = #tpu.dot_dimension_numbers<[1], [0], [0], [1], [0, 0, 1, 1], [], []>} : vector<8x32xf32>, vector<32x128xf32>, vector<8x128xf32> -> vector<8x128xf32>
    %57 = arith.addf %55, %56 : vector<8x128xf32>
    %58 = math.tanh %57 : vector<8x128xf32>
    %59 = vector.extract_strided_slice %58 {offsets = [0, 0], sizes = [8, 32], strides = [1, 1]} : vector<8x128xf32> to vector<8x32xf32>
    %60 = vector.extract_strided_slice %58 {offsets = [0, 32], sizes = [8, 32], strides = [1, 1]} : vector<8x128xf32> to vector<8x32xf32>
    %61 = vector.extract_strided_slice %58 {offsets = [0, 64], sizes = [8, 32], strides = [1, 1]} : vector<8x128xf32> to vector<8x32xf32>
    %62 = vector.extract_strided_slice %58 {offsets = [0, 96], sizes = [8, 32], strides = [1, 1]} : vector<8x128xf32> to vector<8x32xf32>
    %cst_22 = arith.constant 1.000000e+00 : f32
    %63 = vector.broadcast %cst_22 : f32 to vector<8x32xf32>
    %64 = arith.addf %63, %60 : vector<8x32xf32>
    %65 = arith.mulf %64, %48 : vector<8x32xf32>
    %cst_23 = arith.constant 1.000000e+00 : f32
    %66 = vector.broadcast %cst_23 : f32 to vector<8x32xf32>
    %67 = arith.addf %66, %59 : vector<8x32xf32>
    %68 = arith.mulf %67, %61 : vector<8x32xf32>
    %69 = arith.addf %65, %68 : vector<8x32xf32>
    %cst_24 = arith.constant 5.000000e-01 : f32
    %70 = vector.broadcast %cst_24 : f32 to vector<8x32xf32>
    %71 = arith.mulf %70, %69 : vector<8x32xf32>
    %cst_25 = arith.constant 1.000000e+00 : f32
    %72 = vector.broadcast %cst_25 : f32 to vector<8x32xf32>
    %73 = arith.addf %72, %62 : vector<8x32xf32>
    %cst_26 = arith.constant 5.000000e-01 : f32
    %74 = vector.broadcast %cst_26 : f32 to vector<8x32xf32>
    %75 = arith.mulf %74, %73 : vector<8x32xf32>
    %76 = math.tanh %71 : vector<8x32xf32>
    %77 = arith.mulf %75, %76 : vector<8x32xf32>
    %78 = vector.extract_strided_slice %6 {offsets = [24, 0], sizes = [8, 128], strides = [1, 1]} : vector<64x128xf32> to vector<8x128xf32>
    %cst_27 = arith.constant dense<0.000000e+00> : vector<8x128xf32>
    %79 = tpu.matmul %77, %2, %cst_27 {dimension_numbers = #tpu.dot_dimension_numbers<[1], [0], [0], [1], [0, 0, 1, 1], [], []>} : vector<8x32xf32>, vector<32x128xf32>, vector<8x128xf32> -> vector<8x128xf32>
    %80 = arith.addf %78, %79 : vector<8x128xf32>
    %81 = math.tanh %80 : vector<8x128xf32>
    %82 = vector.extract_strided_slice %81 {offsets = [0, 0], sizes = [8, 32], strides = [1, 1]} : vector<8x128xf32> to vector<8x32xf32>
    %83 = vector.extract_strided_slice %81 {offsets = [0, 32], sizes = [8, 32], strides = [1, 1]} : vector<8x128xf32> to vector<8x32xf32>
    %84 = vector.extract_strided_slice %81 {offsets = [0, 64], sizes = [8, 32], strides = [1, 1]} : vector<8x128xf32> to vector<8x32xf32>
    %85 = vector.extract_strided_slice %81 {offsets = [0, 96], sizes = [8, 32], strides = [1, 1]} : vector<8x128xf32> to vector<8x32xf32>
    %cst_28 = arith.constant 1.000000e+00 : f32
    %86 = vector.broadcast %cst_28 : f32 to vector<8x32xf32>
    %87 = arith.addf %86, %83 : vector<8x32xf32>
    %88 = arith.mulf %87, %71 : vector<8x32xf32>
    %cst_29 = arith.constant 1.000000e+00 : f32
    %89 = vector.broadcast %cst_29 : f32 to vector<8x32xf32>
    %90 = arith.addf %89, %82 : vector<8x32xf32>
    %91 = arith.mulf %90, %84 : vector<8x32xf32>
    %92 = arith.addf %88, %91 : vector<8x32xf32>
    %cst_30 = arith.constant 5.000000e-01 : f32
    %93 = vector.broadcast %cst_30 : f32 to vector<8x32xf32>
    %94 = arith.mulf %93, %92 : vector<8x32xf32>
    %cst_31 = arith.constant 1.000000e+00 : f32
    %95 = vector.broadcast %cst_31 : f32 to vector<8x32xf32>
    %96 = arith.addf %95, %85 : vector<8x32xf32>
    %cst_32 = arith.constant 5.000000e-01 : f32
    %97 = vector.broadcast %cst_32 : f32 to vector<8x32xf32>
    %98 = arith.mulf %97, %96 : vector<8x32xf32>
    %99 = math.tanh %94 : vector<8x32xf32>
    %100 = arith.mulf %98, %99 : vector<8x32xf32>
    %101 = vector.extract_strided_slice %6 {offsets = [32, 0], sizes = [8, 128], strides = [1, 1]} : vector<64x128xf32> to vector<8x128xf32>
    %cst_33 = arith.constant dense<0.000000e+00> : vector<8x128xf32>
    %102 = tpu.matmul %100, %2, %cst_33 {dimension_numbers = #tpu.dot_dimension_numbers<[1], [0], [0], [1], [0, 0, 1, 1], [], []>} : vector<8x32xf32>, vector<32x128xf32>, vector<8x128xf32> -> vector<8x128xf32>
    %103 = arith.addf %101, %102 : vector<8x128xf32>
    %104 = math.tanh %103 : vector<8x128xf32>
    %105 = vector.extract_strided_slice %104 {offsets = [0, 0], sizes = [8, 32], strides = [1, 1]} : vector<8x128xf32> to vector<8x32xf32>
    %106 = vector.extract_strided_slice %104 {offsets = [0, 32], sizes = [8, 32], strides = [1, 1]} : vector<8x128xf32> to vector<8x32xf32>
    %107 = vector.extract_strided_slice %104 {offsets = [0, 64], sizes = [8, 32], strides = [1, 1]} : vector<8x128xf32> to vector<8x32xf32>
    %108 = vector.extract_strided_slice %104 {offsets = [0, 96], sizes = [8, 32], strides = [1, 1]} : vector<8x128xf32> to vector<8x32xf32>
    %cst_34 = arith.constant 1.000000e+00 : f32
    %109 = vector.broadcast %cst_34 : f32 to vector<8x32xf32>
    %110 = arith.addf %109, %106 : vector<8x32xf32>
    %111 = arith.mulf %110, %94 : vector<8x32xf32>
    %cst_35 = arith.constant 1.000000e+00 : f32
    %112 = vector.broadcast %cst_35 : f32 to vector<8x32xf32>
    %113 = arith.addf %112, %105 : vector<8x32xf32>
    %114 = arith.mulf %113, %107 : vector<8x32xf32>
    %115 = arith.addf %111, %114 : vector<8x32xf32>
    %cst_36 = arith.constant 5.000000e-01 : f32
    %116 = vector.broadcast %cst_36 : f32 to vector<8x32xf32>
    %117 = arith.mulf %116, %115 : vector<8x32xf32>
    %cst_37 = arith.constant 1.000000e+00 : f32
    %118 = vector.broadcast %cst_37 : f32 to vector<8x32xf32>
    %119 = arith.addf %118, %108 : vector<8x32xf32>
    %cst_38 = arith.constant 5.000000e-01 : f32
    %120 = vector.broadcast %cst_38 : f32 to vector<8x32xf32>
    %121 = arith.mulf %120, %119 : vector<8x32xf32>
    %122 = math.tanh %117 : vector<8x32xf32>
    %123 = arith.mulf %121, %122 : vector<8x32xf32>
    %124 = vector.extract_strided_slice %6 {offsets = [40, 0], sizes = [8, 128], strides = [1, 1]} : vector<64x128xf32> to vector<8x128xf32>
    %cst_39 = arith.constant dense<0.000000e+00> : vector<8x128xf32>
    %125 = tpu.matmul %123, %2, %cst_39 {dimension_numbers = #tpu.dot_dimension_numbers<[1], [0], [0], [1], [0, 0, 1, 1], [], []>} : vector<8x32xf32>, vector<32x128xf32>, vector<8x128xf32> -> vector<8x128xf32>
    %126 = arith.addf %124, %125 : vector<8x128xf32>
    %127 = math.tanh %126 : vector<8x128xf32>
    %128 = vector.extract_strided_slice %127 {offsets = [0, 0], sizes = [8, 32], strides = [1, 1]} : vector<8x128xf32> to vector<8x32xf32>
    %129 = vector.extract_strided_slice %127 {offsets = [0, 32], sizes = [8, 32], strides = [1, 1]} : vector<8x128xf32> to vector<8x32xf32>
    %130 = vector.extract_strided_slice %127 {offsets = [0, 64], sizes = [8, 32], strides = [1, 1]} : vector<8x128xf32> to vector<8x32xf32>
    %131 = vector.extract_strided_slice %127 {offsets = [0, 96], sizes = [8, 32], strides = [1, 1]} : vector<8x128xf32> to vector<8x32xf32>
    %cst_40 = arith.constant 1.000000e+00 : f32
    %132 = vector.broadcast %cst_40 : f32 to vector<8x32xf32>
    %133 = arith.addf %132, %129 : vector<8x32xf32>
    %134 = arith.mulf %133, %117 : vector<8x32xf32>
    %cst_41 = arith.constant 1.000000e+00 : f32
    %135 = vector.broadcast %cst_41 : f32 to vector<8x32xf32>
    %136 = arith.addf %135, %128 : vector<8x32xf32>
    %137 = arith.mulf %136, %130 : vector<8x32xf32>
    %138 = arith.addf %134, %137 : vector<8x32xf32>
    %cst_42 = arith.constant 5.000000e-01 : f32
    %139 = vector.broadcast %cst_42 : f32 to vector<8x32xf32>
    %140 = arith.mulf %139, %138 : vector<8x32xf32>
    %cst_43 = arith.constant 1.000000e+00 : f32
    %141 = vector.broadcast %cst_43 : f32 to vector<8x32xf32>
    %142 = arith.addf %141, %131 : vector<8x32xf32>
    %cst_44 = arith.constant 5.000000e-01 : f32
    %143 = vector.broadcast %cst_44 : f32 to vector<8x32xf32>
    %144 = arith.mulf %143, %142 : vector<8x32xf32>
    %145 = math.tanh %140 : vector<8x32xf32>
    %146 = arith.mulf %144, %145 : vector<8x32xf32>
    %147 = vector.extract_strided_slice %6 {offsets = [48, 0], sizes = [8, 128], strides = [1, 1]} : vector<64x128xf32> to vector<8x128xf32>
    %cst_45 = arith.constant dense<0.000000e+00> : vector<8x128xf32>
    %148 = tpu.matmul %146, %2, %cst_45 {dimension_numbers = #tpu.dot_dimension_numbers<[1], [0], [0], [1], [0, 0, 1, 1], [], []>} : vector<8x32xf32>, vector<32x128xf32>, vector<8x128xf32> -> vector<8x128xf32>
    %149 = arith.addf %147, %148 : vector<8x128xf32>
    %150 = math.tanh %149 : vector<8x128xf32>
    %151 = vector.extract_strided_slice %150 {offsets = [0, 0], sizes = [8, 32], strides = [1, 1]} : vector<8x128xf32> to vector<8x32xf32>
    %152 = vector.extract_strided_slice %150 {offsets = [0, 32], sizes = [8, 32], strides = [1, 1]} : vector<8x128xf32> to vector<8x32xf32>
    %153 = vector.extract_strided_slice %150 {offsets = [0, 64], sizes = [8, 32], strides = [1, 1]} : vector<8x128xf32> to vector<8x32xf32>
    %154 = vector.extract_strided_slice %150 {offsets = [0, 96], sizes = [8, 32], strides = [1, 1]} : vector<8x128xf32> to vector<8x32xf32>
    %cst_46 = arith.constant 1.000000e+00 : f32
    %155 = vector.broadcast %cst_46 : f32 to vector<8x32xf32>
    %156 = arith.addf %155, %152 : vector<8x32xf32>
    %157 = arith.mulf %156, %140 : vector<8x32xf32>
    %cst_47 = arith.constant 1.000000e+00 : f32
    %158 = vector.broadcast %cst_47 : f32 to vector<8x32xf32>
    %159 = arith.addf %158, %151 : vector<8x32xf32>
    %160 = arith.mulf %159, %153 : vector<8x32xf32>
    %161 = arith.addf %157, %160 : vector<8x32xf32>
    %cst_48 = arith.constant 5.000000e-01 : f32
    %162 = vector.broadcast %cst_48 : f32 to vector<8x32xf32>
    %163 = arith.mulf %162, %161 : vector<8x32xf32>
    %cst_49 = arith.constant 1.000000e+00 : f32
    %164 = vector.broadcast %cst_49 : f32 to vector<8x32xf32>
    %165 = arith.addf %164, %154 : vector<8x32xf32>
    %cst_50 = arith.constant 5.000000e-01 : f32
    %166 = vector.broadcast %cst_50 : f32 to vector<8x32xf32>
    %167 = arith.mulf %166, %165 : vector<8x32xf32>
    %168 = math.tanh %163 : vector<8x32xf32>
    %169 = arith.mulf %167, %168 : vector<8x32xf32>
    %170 = vector.extract_strided_slice %6 {offsets = [56, 0], sizes = [8, 128], strides = [1, 1]} : vector<64x128xf32> to vector<8x128xf32>
    %cst_51 = arith.constant dense<0.000000e+00> : vector<8x128xf32>
    %171 = tpu.matmul %169, %2, %cst_51 {dimension_numbers = #tpu.dot_dimension_numbers<[1], [0], [0], [1], [0, 0, 1, 1], [], []>} : vector<8x32xf32>, vector<32x128xf32>, vector<8x128xf32> -> vector<8x128xf32>
    %172 = arith.addf %170, %171 : vector<8x128xf32>
    %173 = math.tanh %172 : vector<8x128xf32>
    %174 = vector.extract_strided_slice %173 {offsets = [0, 0], sizes = [8, 32], strides = [1, 1]} : vector<8x128xf32> to vector<8x32xf32>
    %175 = vector.extract_strided_slice %173 {offsets = [0, 32], sizes = [8, 32], strides = [1, 1]} : vector<8x128xf32> to vector<8x32xf32>
    %176 = vector.extract_strided_slice %173 {offsets = [0, 64], sizes = [8, 32], strides = [1, 1]} : vector<8x128xf32> to vector<8x32xf32>
    %177 = vector.extract_strided_slice %173 {offsets = [0, 96], sizes = [8, 32], strides = [1, 1]} : vector<8x128xf32> to vector<8x32xf32>
    %cst_52 = arith.constant 1.000000e+00 : f32
    %178 = vector.broadcast %cst_52 : f32 to vector<8x32xf32>
    %179 = arith.addf %178, %175 : vector<8x32xf32>
    %180 = arith.mulf %179, %163 : vector<8x32xf32>
    %cst_53 = arith.constant 1.000000e+00 : f32
    %181 = vector.broadcast %cst_53 : f32 to vector<8x32xf32>
    %182 = arith.addf %181, %174 : vector<8x32xf32>
    %183 = arith.mulf %182, %176 : vector<8x32xf32>
    %184 = arith.addf %180, %183 : vector<8x32xf32>
    %cst_54 = arith.constant 5.000000e-01 : f32
    %185 = vector.broadcast %cst_54 : f32 to vector<8x32xf32>
    %186 = arith.mulf %185, %184 : vector<8x32xf32>
    %cst_55 = arith.constant 1.000000e+00 : f32
    %187 = vector.broadcast %cst_55 : f32 to vector<8x32xf32>
    %188 = arith.addf %187, %177 : vector<8x32xf32>
    %cst_56 = arith.constant 5.000000e-01 : f32
    %189 = vector.broadcast %cst_56 : f32 to vector<8x32xf32>
    %190 = arith.mulf %189, %188 : vector<8x32xf32>
    %191 = math.tanh %186 : vector<8x32xf32>
    %192 = arith.mulf %190, %191 : vector<8x32xf32>
    %c0_57 = arith.constant 0 : index
    %c0_58 = arith.constant 0 : index
    %193 = vector.load %arg4[%c0_57, %c0_58] : memref<32x5xf32, #tpu.memory_space<vmem>>, vector<32x5xf32>
    %cst_59 = arith.constant dense<0.000000e+00> : vector<8x5xf32>
    %194 = tpu.matmul %192, %193, %cst_59 {dimension_numbers = #tpu.dot_dimension_numbers<[1], [0], [0], [1], [0, 0, 1, 1], [], []>} : vector<8x32xf32>, vector<32x5xf32>, vector<8x5xf32> -> vector<8x5xf32>
    %c0_60 = arith.constant 0 : index
    %c0_61 = arith.constant 0 : index
    %195 = vector.load %arg5[%c0_60, %c0_61] : memref<1x5xf32, #tpu.memory_space<vmem>>, vector<1x5xf32>
    %196 = vector.broadcast %195 : vector<1x5xf32> to vector<8x5xf32>
    %197 = arith.addf %194, %196 : vector<8x5xf32>
    %c0_62 = arith.constant 0 : index
    %c0_63 = arith.constant 0 : index
    %198 = vector.load %arg6[%c0_62, %c0_63] : memref<5x1xf32, #tpu.memory_space<vmem>>, vector<5x1xf32>
    %cst_64 = arith.constant dense<0.000000e+00> : vector<8x1xf32>
    %199 = tpu.matmul %197, %198, %cst_64 {dimension_numbers = #tpu.dot_dimension_numbers<[1], [0], [0], [1], [0, 0, 1, 1], [], []>} : vector<8x5xf32>, vector<5x1xf32>, vector<8x1xf32> -> vector<8x1xf32>
    %c0_65 = arith.constant 0 : index
    %c0_66 = arith.constant 0 : index
    %200 = vector.load %arg7[%c0_65, %c0_66] : memref<1x1xf32, #tpu.memory_space<vmem>>, vector<1x1xf32>
    %201 = vector.broadcast %200 : vector<1x1xf32> to vector<8x1xf32>
    %202 = arith.addf %199, %201 : vector<8x1xf32>
    %c0_67 = arith.constant 0 : index
    %c0_68 = arith.constant 0 : index
    %203 = vector.load %arg8[%c0_67, %c0_68] : memref<8x1xf32, #tpu.memory_space<vmem>>, vector<8x1xf32>
    tpu.vector_store %arg8[%c0_67, %c0_68], %202 {strides = array<i32>} : memref<8x1xf32, #tpu.memory_space<vmem>>, vector<8x1xf32>,
    return
  }
}

</mosaic_0001>

<bundles_post_ra>
// kernel: tpu_custom_call.1
= control target key start
LH: loop header
LB: loop body
LE: loop exit
PB: predicated region body
PF: predicated region fallthrough
CT: control target
= control target key end

     0   :  { %vm76_vm0 = vcmask 1044480   ;;  %vm51_vm1 = vcmask 39936   ;;  %v1423_v0 = vmov 0.0|0.0   ;;  %vm1424_vm2 = vmmov 0   ;;  %s1426_s19 = smov 64   ;;  %s1427_s20 = smov 32   ;;  %s1673_s2 = inlined_call_operand.vmem [shape: f32[32,128], index: 2, kind: input, shape index: {}]   ;;  %s1674_s1 = inlined_call_operand.vmem [shape: f32[5,128], index: 1, kind: input, shape index: {}]   ;;  %s1675_s0 = inlined_call_operand.vmem [shape: f32[64,5], index: 0, kind: input, shape index: {}]   ;;  %s1676_s3 = inlined_call_operand.vmem [shape: f32[1,128], index: 3, kind: input, shape index: {}]   ;;  %s1677_s4 = inlined_call_operand.vmem [shape: f32[32,5], index: 4, kind: input, shape index: {}]   ;;  %s1678_s6 = inlined_call_operand.vmem [shape: f32[5,1], index: 6, kind: input, shape index: {}]   ;;  %s1679_s7 = inlined_call_operand.<no memory space> [shape: f32[1,1], index: 7, kind: input, shape index: {}]   ;;  %s1680_s5 = inlined_call_operand.vmem [shape: f32[1,5], index: 5, kind: input, shape index: {}]   ;;  %s1681_s8 = inlined_call_operand.vmem [shape: f32[8,1], index: 8, kind: output, shape index: {}]  }
   0x1   :  { %1332 = vmatprep.subr.bf16.mxu1 %v1423_v0  ;;  %v40_v1 = vld [vmem:[%s1673_s2] sm:$0xff]  ;;  %v41_v2 = vld [vmem:[%s1673_s2 + $0x8] sm:$0xff]  ;;  %v42_v7 = vld [vmem:[%s1673_s2 + $0x10] sm:$0xff]  ;;  %v1425_v8 = vmov 0.0   ;;  %vm185_vm3 = vcmask 261120   ;;  %vm1130_vm4 = vcmask 7168  }
   0x2   :  { %v39_v3 = vld [vmem:[%s1674_s1] sm:$0x1f]  ;;  %v1483_v4 = vpack.c.bf16 %v41_v2, %v40_v1  ;;  %v32_v6 = vld [vmem:[%s1675_s0 + $0x8] sm:$0xff]  ;;  %1236 = vmatprep.mubr.msk.f32.mxu1 %vm1424_vm2, %v1425_v8  ;;  %v43_v9 = vld [vmem:[%s1673_s2 + $0x18] sm:$0xff] }
   0x3   :  { %1214 = vmatprep.subr.msk.mxu0 %vm76_vm0, %v39_v3  ;;  %v31_v5 = vld [vmem:[%s1675_s0] sm:$0xff]  ;;  %v1504_v10 = vpack.c.bf16 %v43_v9, %v42_v7  ;;  %v33_v43 = vld [vmem:[%s1675_s0 + $0x10] sm:$0xff]  ;;  %v34_v44 = vld [vmem:[%s1675_s0 + $0x18] sm:$0xff] }
   0x4   :  { %1215 = vmatpush3.msk.msra.mxu0 %vm76_vm0, %v39_v3  ;;  %1216 = vmatprep.mubr.msk.f32.mxu0 %vm51_vm1, %v31_v5  ;;  %v1524_v12 = vld [vmem:[%s1676_s3] ss:$0 sm:$0xff]  ;;  %v36_v46 = vld [vmem:[%s1675_s0 + $0x28] sm:$0xff]  ;;  %v37_v47 = vld [vmem:[%s1675_s0 + $0x30] sm:$0xff] }
   0x5   :  { %1334 = vmatpush3.bf16.msra.mxu1 %v1483_v4  ;;  %1217 = vmatmul.mubr.msk.f32.vlgmr.msra.gmra.mrb[0].mxu0 %vm51_vm1, %v32_v6  ;;  %v35_v45 = vld [vmem:[%s1675_s0 + $0x20] sm:$0xff]  ;;  %v38_v48 = vld [vmem:[%s1675_s0 + $0x38] sm:$0xff] }
   0x6   :  { %1335 = vmatprep.subr.bf16.mxu1 %v1423_v0  ;;  %1344 = vmatprep.subr.bf16.mxu0 %v1423_v0 }
   0x7   :  { %1346 = vmatpush3.bf16.msra.mxu0 %v1483_v4  ;;  %1219 = vmatprep.mubr.msk.f32.mxu0 %vm51_vm1, %v33_v43 }
   0x8   :  { %1347 = vmatprep.subr.bf16.mxu0 %v1423_v0 }
   0x9   :  { %1337 = vmatpush3.bf16.msra.mxu1 %v1504_v10  ;;  %1220 = vmatmul.mubr.msk.f32.gmra.mrb[2].mxu0 %vm51_vm1, %v34_v44 }
   0xa   :  { %1338 = vmatprep.subr.bf16.mxu1 %v1423_v0  ;;  %1222 = vmatprep.mubr.msk.f32.mxu0 %vm51_vm1, %v35_v45 }
   0xb   :  { %1349 = vmatpush3.bf16.msra.mxu0 %v1504_v10 }
   0xc   :  { %1237 = vmatmul.mubr.f32.vlgmr.msra.gmra.mrb[0].mxu1 %v1425_v8  ;;  %1356 = vmatprep.subr.bf16.mxu0 %v1423_v0 }
   0xd   :  { %1340 = vmatpush3.bf16.msra.mxu1 %v1483_v4  ;;  %1247 = vmatprep.mubr.msk.f32.mxu1 %vm1424_vm2, %v1425_v8 }
   0xe   :  { %1341 = vmatprep.subr.bf16.mxu1 %v1423_v0  ;;  %1223 = vmatmul.mubr.msk.f32.gmra.mrb[4].mxu0 %vm51_vm1, %v36_v46 }
   0xf   :  { %1225 = vmatprep.mubr.msk.f32.mxu0 %vm51_vm1, %v37_v47 }
  0x11   :  { %1343 = vmatpush3.bf16.msra.mxu1 %v1504_v10 }
  0x12   :  { %1350 = vmatprep.subr.bf16.mxu1 %v1423_v0  ;;  %1226 = vmatmul.mubr.msk.f32.gmra.mrb[6].mxu0 %vm51_vm1, %v38_v48 }
  0x13   :  { %1258 = vmatprep.mubr.msk.f32.mxu0 %vm1424_vm2, %v1425_v8 }
  0xd8   :  { %v1218_v11 = vpop.f32.mrb[0].mxu0 }
  0xd9   :  { %v146_v13 = vpop.f32.mrb[1].mxu0  ;;  %v152_v31 = vadd.f32 %v1218_v11, %v1524_v12 }
  0xda   :  { %v147_v14 = vadd.f32 %v1524_v12, %v146_v13 }
  0xdc   :  { %v1221_v53 = vpop.f32.mrb[2].mxu0 }
  0xdd   :  { %v156_v54 = vpop.f32.mrb[3].mxu0 }
  0xde   :  { %v157_v60 = vadd.f32 %v1524_v12, %v156_v54 }
  0xdf   :  { %v255_v15 = vpop.f32.mrb[0].mxu1 }
  0xe0   :  { %v259_v16 = vadd.f32 %v255_v15, %v147_v14  ;;  %v1238_v17 = vpop.f32.mrb[1].mxu1 }
  0xe1   :  { %v1569_v55 = vpop.f32.mrb[4].mxu0 }
  0xe2   :  { %1391 = vtanh.f32 %v259_v16  ;;  %v1571_v56 = vpop.f32.mrb[5].mxu0 }
  0xe5   :  { %v1573_v57 = vpop.f32.mrb[6].mxu0 }
  0xe6   :  { %v1575_v58 = vpop.f32.mrb[7].mxu0 }
  0xec   :  { %v1392_v18 = vpop.eup %1391 }
  0xed   :  { %264 = vrot.lane.b32.xlu0 %v1392_v18, %s1426_s19  ;;  %v261_v19 = vadd.f32 1.0, %v1392_v18  ;;  %v162_v18 = vadd.f32 %v1221_v53, %v1524_v12 }
  0xef   :  { %v262_v22 = vmul.f32 0.0, %v261_v19  ;;  %v274_v27 = vmul.f32 0.5, %v261_v19 }
 0x15f   :  { %v265_v20 = vpop.permute.xlu0 %264 }
 0x160   :  { %v267_v21 = vmul.f32 %v265_v20, %v261_v19 }
 0x162   :  { %269 = vrot.lane.b32.xlu0 %v267_v21, %s1427_s20 }
 0x1d4   :  { %v270_v23 = vpop.permute.xlu0 %269 }
 0x1d5   :  { %v272_v24 = vadd.f32 %v270_v23, %v262_v22 }
 0x1d7   :  { %v273_v25 = vmul.f32 0.5, %v272_v24 }
 0x1d9   :  { %1393 = vtanh.f32 %v273_v25 }
 0x1e3   :  { %v1394_v26 = vpop.eup %1393 }
 0x1e4   :  { %277 = vrot.lane.b32.xlu1 %v1394_v26, %s1426_s19 }
 0x256   :  { %v278_v28 = vpop.permute.xlu1 %277 }
 0x257   :  { %v280_v29 = vmul.f32 %v278_v28, %v274_v27 }
 0x259   :  { %282 = vrot.lane.b32.xlu1 %v280_v29, %s1427_s20 }
 0x2cb   :  { %v283_v30 = vpop.permute.xlu1 %282 }
 0x2cc   :  { %1248 = vmatmul.mubr.msk.f32.vlgmr.msra.gmra.mrb[2].mxu1 %vm185_vm3, %v283_v30 }
 0x2cd   :  { %1352 = vmatpush3.bf16.msra.mxu1 %v1483_v4  ;;  %1269 = vmatprep.mubr.msk.f32.mxu1 %vm1424_vm2, %v1425_v8 }
 0x2ce   :  { %1353 = vmatprep.subr.bf16.mxu1 %v1423_v0 }
 0x2d1   :  { %1355 = vmatpush3.bf16.msra.mxu1 %v1504_v10 }
 0x2d2   :  { %1362 = vmatprep.subr.bf16.mxu1 %v1423_v0 }
 0x39f   :  { %v352_v32 = vpop.f32.mrb[2].mxu1 }
 0x3a0   :  { %v356_v33 = vadd.f32 %v352_v32, %v152_v31  ;;  %v1249_v34 = vpop.f32.mrb[3].mxu1 }
 0x3a2   :  { %1395 = vtanh.f32 %v356_v33 }
 0x3ac   :  { %v1396_v35 = vpop.eup %1395 }
 0x3ad   :  { %361 = vrot.lane.b32.xlu0 %v1396_v35, %s1426_s19  ;;  %v358_v36 = vadd.f32 1.0, %v1396_v35  ;;  %v167_v35 = vadd.f32 %v1524_v12, %v1571_v56 }
 0x3af   :  { %v359_v39 = vmul.f32 %v358_v36, %v273_v25  ;;  %v371_v50 = vmul.f32 0.5, %v358_v36 }
 0x41f   :  { %v362_v37 = vpop.permute.xlu0 %361 }
 0x420   :  { %v364_v38 = vmul.f32 %v362_v37, %v358_v36 }
 0x422   :  { %366 = vrot.lane.b32.xlu1 %v364_v38, %s1427_s20 }
 0x494   :  { %v367_v40 = vpop.permute.xlu1 %366 }
 0x495   :  { %v369_v41 = vadd.f32 %v367_v40, %v359_v39 }
 0x497   :  { %v370_v42 = vmul.f32 0.5, %v369_v41 }
 0x499   :  { %1397 = vtanh.f32 %v370_v42 }
 0x4a3   :  { %v1398_v49 = vpop.eup %1397 }
 0x4a4   :  { %374 = vrot.lane.b32.xlu0 %v1398_v49, %s1426_s19 }
 0x516   :  { %v375_v51 = vpop.permute.xlu0 %374 }
 0x517   :  { %v377_v52 = vmul.f32 %v375_v51, %v371_v50 }
 0x519   :  { %379 = vrot.lane.b32.xlu1 %v377_v52, %s1427_s20  ;;  %v172_v52 = vadd.f32 %v1569_v55, %v1524_v12 }
 0x58b   :  { %v380_v59 = vpop.permute.xlu1 %379 }
 0x58c   :  { %1259 = vmatmul.mubr.msk.f32.vlgmr.msra.gmra.mrb[8].mxu0 %vm185_vm3, %v380_v59 }
 0x58d   :  { %1358 = vmatpush3.bf16.msra.mxu0 %v1483_v4  ;;  %1280 = vmatprep.mubr.msk.f32.mxu0 %vm1424_vm2, %v1425_v8 }
 0x58e   :  { %1359 = vmatprep.subr.bf16.mxu0 %v1423_v0 }
 0x591   :  { %1361 = vmatpush3.bf16.msra.mxu0 %v1504_v10 }
 0x592   :  { %1368 = vmatprep.subr.bf16.mxu0 %v1423_v0 }
 0x65f   :  { %v449_v61 = vpop.f32.mrb[8].mxu0 }
 0x660   :  { %v453_v62 = vadd.f32 %v449_v61, %v157_v60  ;;  %v1260_v63 = vpop.f32.mrb[9].mxu0 }
 0x662   :  { %1399 = vtanh.f32 %v453_v62 }
 0x66c   :  { %v1400_v1 = vpop.eup %1399 }
 0x66d   :  { %458 = vrot.lane.b32.xlu0 %v1400_v1, %s1426_s19  ;;  %v455_v2 = vadd.f32 1.0, %v1400_v1 }
 0x66f   :  { %v456_v6 = vmul.f32 %v455_v2, %v370_v42  ;;  %v468_v14 = vmul.f32 0.5, %v455_v2 }
 0x6df   :  { %v459_v3 = vpop.permute.xlu0 %458 }
 0x6e0   :  { %v461_v5 = vmul.f32 %v459_v3, %v455_v2 }
 0x6e2   :  { %463 = vrot.lane.b32.xlu1 %v461_v5, %s1427_s20 }
 0x754   :  { %v464_v7 = vpop.permute.xlu1 %463 }
 0x755   :  { %v466_v9 = vadd.f32 %v464_v7, %v456_v6  ;;  %v177_v7 = vadd.f32 %v1524_v12, %v1575_v58 }
 0x757   :  { %v467_v11 = vmul.f32 0.5, %v466_v9 }
 0x759   :  { %1401 = vtanh.f32 %v467_v11 }
 0x763   :  { %v1402_v13 = vpop.eup %1401 }
 0x764   :  { %471 = vrot.lane.b32.xlu0 %v1402_v13, %s1426_s19 }
 0x7d6   :  { %v472_v15 = vpop.permute.xlu0 %471 }
 0x7d7   :  { %v474_v16 = vmul.f32 %v472_v15, %v468_v14 }
 0x7d9   :  { %476 = vrot.lane.b32.xlu1 %v474_v16, %s1427_s20 }
 0x84b   :  { %v477_v17 = vpop.permute.xlu1 %476 }
 0x84c   :  { %1270 = vmatmul.mubr.msk.f32.vlgmr.msra.gmra.mrb[4].mxu1 %vm185_vm3, %v477_v17 }
 0x84d   :  { %1364 = vmatpush3.bf16.msra.mxu1 %v1483_v4  ;;  %1291 = vmatprep.mubr.msk.f32.mxu1 %vm1424_vm2, %v1425_v8 }
 0x84e   :  { %1365 = vmatprep.subr.bf16.mxu1 %v1423_v0 }
 0x851   :  { %1367 = vmatpush3.bf16.msra.mxu1 %v1504_v10 }
 0x852   :  { %1374 = vmatprep.subr.bf16.mxu1 %v1423_v0 }
 0x91f   :  { %v546_v19 = vpop.f32.mrb[4].mxu1 }
 0x920   :  { %v550_v20 = vadd.f32 %v546_v19, %v162_v18  ;;  %v1271_v21 = vpop.f32.mrb[5].mxu1 }
 0x922   :  { %1403 = vtanh.f32 %v550_v20 }
 0x92c   :  { %v1404_v22 = vpop.eup %1403 }
 0x92d   :  { %555 = vrot.lane.b32.xlu0 %v1404_v22, %s1426_s19  ;;  %v552_v23 = vadd.f32 1.0, %v1404_v22 }
 0x92f   :  { %v553_v26 = vmul.f32 %v552_v23, %v467_v11  ;;  %v565_v31 = vmul.f32 0.5, %v552_v23 }
 0x99f   :  { %v556_v24 = vpop.permute.xlu0 %555 }
 0x9a0   :  { %v558_v25 = vmul.f32 %v556_v24, %v552_v23 }
 0x9a2   :  { %560 = vrot.lane.b32.xlu1 %v558_v25, %s1427_s20 }
 0xa14   :  { %v561_v27 = vpop.permute.xlu1 %560 }
 0xa15   :  { %v563_v28 = vadd.f32 %v561_v27, %v553_v26  ;;  %v182_v26 = vadd.f32 %v1573_v57, %v1524_v12  ;;  %v961_v12 = vld [vmem:[%s1677_s4 + $0x8] sm:$0xff]  ;;  %v962_v57 = vld [vmem:[%s1677_s4 + $0x10] sm:$0xff] }
 0xa17   :  { %v564_v29 = vmul.f32 0.5, %v563_v28 }
 0xa19   :  { %1405 = vtanh.f32 %v564_v29 }
 0xa23   :  { %v1406_v30 = vpop.eup %1405 }
 0xa24   :  { %568 = vrot.lane.b32.xlu0 %v1406_v30, %s1426_s19 }
 0xa96   :  { %v569_v32 = vpop.permute.xlu0 %568 }
 0xa97   :  { %v571_v33 = vmul.f32 %v569_v32, %v565_v31 }
 0xa99   :  { %573 = vrot.lane.b32.xlu1 %v571_v33, %s1427_s20 }
 0xb0b   :  { %v574_v34 = vpop.permute.xlu1 %573 }
 0xb0c   :  { %1281 = vmatmul.mubr.msk.f32.vlgmr.msra.gmra.mrb[10].mxu0 %vm185_vm3, %v574_v34 }
 0xb0d   :  { %1370 = vmatpush3.bf16.msra.mxu0 %v1483_v4  ;;  %1302 = vmatprep.mubr.msk.f32.mxu0 %vm1424_vm2, %v1425_v8 }
 0xb0e   :  { %1371 = vmatprep.subr.bf16.mxu0 %v1423_v0 }
 0xb11   :  { %1373 = vmatpush3.bf16.msra.mxu0 %v1504_v10 }
 0xb12   :  { %1380 = vmatprep.subr.bf16.mxu0 %v1423_v0 }
 0xbdf   :  { %v643_v36 = vpop.f32.mrb[10].mxu0 }
 0xbe0   :  { %v647_v37 = vadd.f32 %v643_v36, %v167_v35  ;;  %v1282_v38 = vpop.f32.mrb[11].mxu0 }
 0xbe2   :  { %1407 = vtanh.f32 %v647_v37 }
 0xbec   :  { %v1408_v39 = vpop.eup %1407 }
 0xbed   :  { %652 = vrot.lane.b32.xlu0 %v1408_v39, %s1426_s19  ;;  %v649_v40 = vadd.f32 1.0, %v1408_v39  ;;  %v963_v39 = vld [vmem:[%s1677_s4 + $0x18] sm:$0xff] }
 0xbef   :  { %v650_v43 = vmul.f32 %v649_v40, %v564_v29  ;;  %v662_v48 = vmul.f32 0.5, %v649_v40 }
 0xc5f   :  { %v653_v41 = vpop.permute.xlu0 %652 }
 0xc60   :  { %v655_v42 = vmul.f32 %v653_v41, %v649_v40  ;;  %v1384_v40 = vpack.c.bf16 %v963_v39, %v962_v57 }
 0xc62   :  { %657 = vrot.lane.b32.xlu1 %v655_v42, %s1427_s20  ;;  %v1046_v42 = vld [vmem:[%s1678_s6] sm:$0x1f] }
 0xcd4   :  { %v658_v44 = vpop.permute.xlu1 %657 }
 0xcd5   :  { %v660_v45 = vadd.f32 %v658_v44, %v650_v43 }
 0xcd7   :  { %v661_v46 = vmul.f32 0.5, %v660_v45 }
 0xcd9   :  { %1409 = vtanh.f32 %v661_v46 }
 0xce3   :  { %v1410_v47 = vpop.eup %1409 }
 0xce4   :  { %665 = vrot.lane.b32.xlu0 %v1410_v47, %s1426_s19  ;;  %v1153_v47 = vld [vmem:[%s1680_s5] ss:$0 sm:$0xff] }
 0xd56   :  { %v666_v49 = vpop.permute.xlu0 %665 }
 0xd57   :  { %v668_v50 = vmul.f32 %v666_v49, %v662_v48 }
 0xd59   :  { %670 = vrot.lane.b32.xlu1 %v668_v50, %s1427_s20 }
 0xdcb   :  { %v671_v51 = vpop.permute.xlu1 %670 }
 0xdcc   :  { %1292 = vmatmul.mubr.msk.f32.vlgmr.msra.gmra.mrb[6].mxu1 %vm185_vm3, %v671_v51 }
 0xdcd   :  { %1376 = vmatpush3.bf16.msra.mxu1 %v1483_v4  ;;  %1313 = vmatprep.mubr.msk.f32.mxu1 %vm1424_vm2, %v1425_v8 }
 0xdce   :  { %1377 = vmatprep.subr.bf16.mxu1 %v1423_v0 }
 0xdd1   :  { %1379 = vmatpush3.bf16.msra.mxu1 %v1504_v10 }
 0xdd2   :  { %1327 = vmatprep.subr.mxu1 %v1425_v8 }
 0xe9f   :  { %v740_v53 = vpop.f32.mrb[6].mxu1 }
 0xea0   :  { %v744_v54 = vadd.f32 %v740_v53, %v172_v52  ;;  %v1293_v56 = vpop.f32.mrb[7].mxu1 }
 0xea2   :  { %1411 = vtanh.f32 %v744_v54 }
 0xeac   :  { %v1412_v59 = vpop.eup %1411 }
 0xead   :  { %749 = vrot.lane.b32.xlu0 %v1412_v59, %s1426_s19  ;;  %v746_v4 = vadd.f32 1.0, %v1412_v59 }
 0xeaf   :  { %v747_v62 = vmul.f32 %v746_v4, %v661_v46  ;;  %v759_v55 = vmul.f32 0.5, %v746_v4 }
 0xf1f   :  { %v750_v60 = vpop.permute.xlu0 %749 }
 0xf20   :  { %v752_v61 = vmul.f32 %v750_v60, %v746_v4 }
 0xf22   :  { %754 = vrot.lane.b32.xlu1 %v752_v61, %s1427_s20 }
 0xf94   :  { %v755_v63 = vpop.permute.xlu1 %754 }
 0xf95   :  { %v757_v10 = vadd.f32 %v755_v63, %v747_v62 }
 0xf97   :  { %v758_v1 = vmul.f32 0.5, %v757_v10 }
 0xf99   :  { %1413 = vtanh.f32 %v758_v1 }
 0xfa3   :  { %v1414_v2 = vpop.eup %1413 }
 0xfa4   :  { %762 = vrot.lane.b32.xlu0 %v1414_v2, %s1426_s19 }
0x1016   :  { %v763_v3 = vpop.permute.xlu0 %762 }
0x1017   :  { %v765_v5 = vmul.f32 %v763_v3, %v759_v55 }
0x1019   :  { %767 = vrot.lane.b32.xlu1 %v765_v5, %s1427_s20 }
0x108b   :  { %v768_v6 = vpop.permute.xlu1 %767 }
0x108c   :  { %1303 = vmatmul.mubr.msk.f32.vlgmr.msra.gmra.mrb[12].mxu0 %vm185_vm3, %v768_v6 }
0x108d   :  { %1324 = vmatprep.mubr.msk.f32.mxu0 %vm1424_vm2, %v1425_v8 }
0x115f   :  { %v837_v9 = vpop.f32.mrb[12].mxu0 }
0x1160   :  { %v841_v11 = vadd.f32 %v837_v9, %v177_v7  ;;  %v1304_v13 = vpop.f32.mrb[13].mxu0 }
0x1162   :  { %1415 = vtanh.f32 %v841_v11 }
0x116c   :  { %v1416_v14 = vpop.eup %1415 }
0x116d   :  { %846 = vrot.lane.b32.xlu0 %v1416_v14, %s1426_s19  ;;  %v843_v15 = vadd.f32 1.0, %v1416_v14 }
0x116f   :  { %v844_v18 = vmul.f32 %v843_v15, %v758_v1  ;;  %v856_v58 = vmul.f32 0.5, %v843_v15 }
0x11df   :  { %v847_v16 = vpop.permute.xlu0 %846 }
0x11e0   :  { %v849_v17 = vmul.f32 %v847_v16, %v843_v15 }
0x11e2   :  { %851 = vrot.lane.b32.xlu1 %v849_v17, %s1427_s20 }
0x1254   :  { %v852_v19 = vpop.permute.xlu1 %851 }
0x1255   :  { %v854_v20 = vadd.f32 %v852_v19, %v844_v18 }
0x1257   :  { %v855_v21 = vmul.f32 0.5, %v854_v20 }
0x1259   :  { %1417 = vtanh.f32 %v855_v21 }
0x1263   :  { %v1418_v22 = vpop.eup %1417 }
0x1264   :  { %859 = vrot.lane.b32.xlu0 %v1418_v22, %s1426_s19 }
0x12d6   :  { %v860_v23 = vpop.permute.xlu0 %859 }
0x12d7   :  { %v862_v24 = vmul.f32 %v860_v23, %v856_v58 }
0x12d9   :  { %864 = vrot.lane.b32.xlu1 %v862_v24, %s1427_s20 }
0x134b   :  { %v865_v25 = vpop.permute.xlu1 %864 }
0x134c   :  { %1314 = vmatmul.mubr.msk.f32.vlgmr.msra.gmra.mrb[8].mxu1 %vm185_vm3, %v865_v25 }
0x134d   :  { %1329 = vmatprep.mubr.msk.f32.mxu1 %vm1424_vm2, %v1425_v8  ;;  %v960_v8 = vld [vmem:[%s1677_s4] sm:$0xff]  ;;  %1328 = vmatpush3.msk.msra.mxu1 %vm76_vm0, %v1046_v42 }
0x134e   :  { %v1381_v38 = vpack.c.bf16 %v961_v12, %v960_v8 }
0x1350   :  { %1382 = vmatpush3.bf16.msra.mxu0 %v1381_v38 }
0x1351   :  { %1383 = vmatprep.subr.bf16.mxu0 %v1423_v0  ;;  %v13_v0 = vstv %s1679_s7 }
0x1352   :  { %14 = vst [vmem:[#allocation2] sm:$0x1] %v13_v0 }
0x1354   :  { %1385 = vmatpush3.bf16.msra.mxu0 %v1384_v40 }
0x1359   :  { %v1155_v51 = vld [vmem:[#allocation2] ss:$0 sm:$0xff] }
0x141f   :  { %v934_v27 = vpop.f32.mrb[8].mxu1 }
0x1420   :  { %v938_v28 = vadd.f32 %v934_v27, %v182_v26  ;;  %v1315_v29 = vpop.f32.mrb[9].mxu1 }
0x1422   :  { %1419 = vtanh.f32 %v938_v28 }
0x142c   :  { %v1420_v30 = vpop.eup %1419 }
0x142d   :  { %943 = vrot.lane.b32.xlu0 %v1420_v30, %s1426_s19  ;;  %v940_v31 = vadd.f32 1.0, %v1420_v30 }
0x142f   :  { %v941_v34 = vmul.f32 %v940_v31, %v855_v21  ;;  %v953_v43 = vmul.f32 0.5, %v940_v31 }
0x149f   :  { %v944_v32 = vpop.permute.xlu0 %943 }
0x14a0   :  { %v946_v33 = vmul.f32 %v944_v32, %v940_v31 }
0x14a2   :  { %948 = vrot.lane.b32.xlu1 %v946_v33, %s1427_s20 }
0x1514   :  { %v949_v35 = vpop.permute.xlu1 %948 }
0x1515   :  { %v951_v36 = vadd.f32 %v949_v35, %v941_v34 }
0x1517   :  { %v952_v37 = vmul.f32 0.5, %v951_v36 }
0x1519   :  { %1421 = vtanh.f32 %v952_v37 }
0x1523   :  { %v1422_v41 = vpop.eup %1421 }
0x1524   :  { %956 = vrot.lane.b32.xlu0 %v1422_v41, %s1426_s19 }
0x1596   :  { %v957_v44 = vpop.permute.xlu0 %956 }
0x1597   :  { %v959_v45 = vmul.f32 %v957_v44, %v953_v43 }
0x1599   :  { %972 = vrot.lane.b32.xlu1 %v959_v45, %s1427_s20 }
0x160b   :  { %v973_v46 = vpop.permute.xlu1 %972 }
0x160c   :  { %1325 = vmatmul.mubr.msk.f32.vlgmr.msra.gmra.mrb[14].mxu0 %vm185_vm3, %v973_v46 }
0x16df   :  { %v1042_v48 = vpop.f32.mrb[14].mxu0 }
0x16e0   :  { %v1043_v49 = vadd.f32 %v1153_v47, %v1042_v48  ;;  %v1326_v50 = vpop.f32.mrb[15].mxu0 }
0x16e2   :  { %1330 = vmatmul.mubr.msk.f32.vlgmr.msra.gmra.mrb[10].mxu1 %vm51_vm1, %v1043_v49 }
0x17b5   :  { %v1126_v52 = vpop.f32.mrb[10].mxu1 }
0x17b6   :  { %v1127_v53 = vadd.f32 %v1155_v51, %v1126_v52  ;;  %v1331_v54 = vpop.f32.mrb[11].mxu1 }
0x17b8   :  { %1131 = vst.msk [vmem:[%s1681_s8] sm:$0xff] %vm1130_vm4, %v1127_v53 }

</bundles_post_ra>
